<compile_context>
chip_gen: v6e
topology: v6e:2x2x1
jax: 0.10.0
libtpu: 0.0.40
codegen_flags: <defaults>
</compile_context>

<pallas_src>
import functools
import math

import jax
import jax.numpy as jnp
from jax.experimental import pallas as pl
from jax.experimental.pallas import tpu as pltpu


# ----------------------------------------------------------------------------
# Tiling helper
# ----------------------------------------------------------------------------
def _pick_tile(dim, candidates=(512, 256, 128)):
    """Largest candidate that evenly divides `dim`; else the full dim."""
    for c in candidates:
        if dim % c == 0:
            return c
    return dim


# ----------------------------------------------------------------------------
# Tiled linear (+ optional ReLU)
# ----------------------------------------------------------------------------
def _matmul_kernel(x_ref, w_ref, b_ref, o_ref, acc_ref, *, activation):
    @pl.when(pl.program_id(2) == 0)
    def _():
        acc_ref[...] = jnp.zeros_like(acc_ref)

    acc_ref[...] += jnp.dot(x_ref[...], w_ref[...],
                            preferred_element_type=jnp.float32)

    @pl.when(pl.program_id(2) == pl.num_programs(2) - 1)
    def _():
        y = acc_ref[...] + b_ref[...].astype(jnp.float32)
        if activation == "relu":
            y = jnp.maximum(y, 0.0)
        o_ref[...] = y.astype(o_ref.dtype)


def linear(x, w, b, activation=None):
    """y = act(x @ w + b); x: [M,K], w: [K,N], b: [N]. Tiled, f32 accumulate."""
    M, K = x.shape
    N = w.shape[1]
    tm = _pick_tile(M)
    tn = _pick_tile(N)
    tk = _pick_tile(K)
    return pl.pallas_call(
        functools.partial(_matmul_kernel, activation=activation),
        out_shape=jax.ShapeDtypeStruct((M, N), x.dtype),
        grid=(M // tm, N // tn, K // tk),
        in_specs=[
            pl.BlockSpec((tm, tk), lambda i, j, k: (i, k)),
            pl.BlockSpec((tk, tn), lambda i, j, k: (k, j)),
            pl.BlockSpec((1, tn), lambda i, j, k: (0, j)),
        ],
        out_specs=pl.BlockSpec((tm, tn), lambda i, j, k: (i, j)),
        scratch_shapes=[pltpu.VMEM((tm, tn), jnp.float32)],
        compiler_params=pltpu.CompilerParams(
            dimension_semantics=("parallel", "parallel", "arbitrary")),
    )(x, w, b.reshape(1, N))


# ----------------------------------------------------------------------------
# Tiled linear with fused residual-add + LayerNorm epilogue
# ----------------------------------------------------------------------------
def _matmul_res_ln_kernel(x_ref, w_ref, b_ref, r_ref, g_ref, bb_ref,
                          o_ref, acc_ref, *, eps):
    @pl.when(pl.program_id(1) == 0)
    def _():
        acc_ref[...] = jnp.zeros_like(acc_ref)

    acc_ref[...] += jnp.dot(x_ref[...], w_ref[...],
                            preferred_element_type=jnp.float32)

    @pl.when(pl.program_id(1) == pl.num_programs(1) - 1)
    def _():
        y = (acc_ref[...] + b_ref[...].astype(jnp.float32)
             + r_ref[...].astype(jnp.float32))
        mean = jnp.mean(y, axis=-1, keepdims=True)
        var = jnp.mean((y - mean) ** 2, axis=-1, keepdims=True)
        yhat = (y - mean) * jax.lax.rsqrt(var + eps)
        o_ref[...] = (yhat * g_ref[...].astype(jnp.float32)
                      + bb_ref[...].astype(jnp.float32)).astype(o_ref.dtype)


def linear_res_ln(x, w, b, residual, gamma, beta, eps=1e-5):
    """LayerNorm(residual + (x @ w + b)) over the last dim, fused."""
    M, K = x.shape
    N = w.shape[1]
    tm = _pick_tile(M)
    tk = _pick_tile(K)
    return pl.pallas_call(
        functools.partial(_matmul_res_ln_kernel, eps=eps),
        out_shape=jax.ShapeDtypeStruct((M, N), x.dtype),
        grid=(M // tm, K // tk),
        in_specs=[
            pl.BlockSpec((tm, tk), lambda i, k: (i, k)),
            pl.BlockSpec((tk, N), lambda i, k: (k, 0)),
            pl.BlockSpec((1, N), lambda i, k: (0, 0)),
            pl.BlockSpec((tm, N), lambda i, k: (i, 0)),
            pl.BlockSpec((1, N), lambda i, k: (0, 0)),
            pl.BlockSpec((1, N), lambda i, k: (0, 0)),
        ],
        out_specs=pl.BlockSpec((tm, N), lambda i, k: (i, 0)),
        scratch_shapes=[pltpu.VMEM((tm, N), jnp.float32)],
        compiler_params=pltpu.CompilerParams(
            dimension_semantics=("parallel", "arbitrary")),
    )(x, w, b.reshape(1, N), residual, gamma.reshape(1, N), beta.reshape(1, N))


# ----------------------------------------------------------------------------
# Fully fused position-wise FFN + residual + LayerNorm
# ----------------------------------------------------------------------------
def _ffn_res_ln_kernel(x_ref, w1_ref, b1_ref, w2_ref, b2_ref,
                       r_ref, g_ref, bb_ref, o_ref, *, eps):
    h = jnp.dot(x_ref[...], w1_ref[...], preferred_element_type=jnp.float32)
    h = jnp.maximum(h + b1_ref[...].astype(jnp.float32), 0.0)
    y = jnp.dot(h, w2_ref[...].astype(jnp.float32),
                preferred_element_type=jnp.float32)
    y = y + b2_ref[...].astype(jnp.float32) + r_ref[...].astype(jnp.float32)
    mean = jnp.mean(y, axis=-1, keepdims=True)
    var = jnp.mean((y - mean) ** 2, axis=-1, keepdims=True)
    yhat = (y - mean) * jax.lax.rsqrt(var + eps)
    o_ref[...] = (yhat * g_ref[...].astype(jnp.float32)
                  + bb_ref[...].astype(jnp.float32)).astype(o_ref.dtype)


def ffn_res_ln(x, pf, residual, gamma, beta, eps=1e-5):
    """LayerNorm(residual + W2 @ relu(W1 @ x + b1) + b2) in one kernel."""
    M, D = x.shape
    F = pf["w1"].shape[1]
    tm = _pick_tile(M, (256, 128))
    return pl.pallas_call(
        functools.partial(_ffn_res_ln_kernel, eps=eps),
        out_shape=jax.ShapeDtypeStruct((M, D), x.dtype),
        grid=(M // tm,),
        in_specs=[
            pl.BlockSpec((tm, D), lambda i: (i, 0)),
            pl.BlockSpec((D, F), lambda i: (0, 0)),
            pl.BlockSpec((1, F), lambda i: (0, 0)),
            pl.BlockSpec((F, D), lambda i: (0, 0)),
            pl.BlockSpec((1, D), lambda i: (0, 0)),
            pl.BlockSpec((tm, D), lambda i: (i, 0)),
            pl.BlockSpec((1, D), lambda i: (0, 0)),
            pl.BlockSpec((1, D), lambda i: (0, 0)),
        ],
        out_specs=pl.BlockSpec((tm, D), lambda i: (i, 0)),
        compiler_params=pltpu.CompilerParams(
            dimension_semantics=("parallel",)),
    )(x, pf["w1"], pf["b1"].reshape(1, F), pf["w2"], pf["b2"].reshape(1, D),
      residual, gamma.reshape(1, D), beta.reshape(1, D))


# ----------------------------------------------------------------------------
# Multi-head scaled-dot-product attention core: all heads in one grid step,
# lane-dense [Lq, D] context output, optional attention-weights output.
# ----------------------------------------------------------------------------
def _mha_kernel(q_ref, k_ref, v_ref, m_ref, o_ref, *rest,
                n_heads, inv_scale, return_attn):
    a_ref = rest[0] if return_attn else None
    D = q_ref.shape[2]
    Dh = D // n_heads

    q = q_ref[0]          # (Lq, D)
    k = k_ref[0]          # (Lk, D)
    v = v_ref[0]          # (Lk, D)
    mask = m_ref[0]       # (mq, Lk) with mq in {1, Lq}; 0 => masked out

    outs = []
    for h in range(n_heads):
        lo, hi = h * Dh, (h + 1) * Dh
        qh = q[:, lo:hi].astype(jnp.float32) * inv_scale     # scale folded in
        kh = k[:, lo:hi].astype(jnp.float32)
        vh = v[:, lo:hi].astype(jnp.float32)

        energy = jnp.dot(qh, kh.T, preferred_element_type=jnp.float32)
        energy = jnp.where(mask == 0, -1e10, energy)

        mx = jnp.max(energy, axis=-1, keepdims=True)
        p = jnp.exp(energy - mx)
        denom = jnp.sum(p, axis=-1, keepdims=True)
        attn = p * pl.reciprocal(denom, approx=True)          # EUP, ~free

        outs.append(jnp.dot(attn, vh, preferred_element_type=jnp.float32))
        if return_attn:
            a_ref[0, h] = attn.astype(a_ref.dtype)

    # heads packed back into hid_dim -> single lane-dense store
    o_ref[0] = jnp.concatenate(outs, axis=-1).astype(o_ref.dtype)


def mha_core(q, k, v, mask, n_heads, return_attention):
    """q: [B,Lq,D], k/v: [B,Lk,D], mask: [B,{1|Lq},Lk] -> (ctx [B,Lq,D], attn?)."""
    B, Lq, D = q.shape
    Lk = k.shape[1]
    mq = mask.shape[1]
    inv_scale = 1.0 / math.sqrt(D // n_heads)

    kern = functools.partial(_mha_kernel, n_heads=n_heads,
                             inv_scale=inv_scale, return_attn=return_attention)
    in_specs = [
        pl.BlockSpec((1, Lq, D), lambda b: (b, 0, 0)),
        pl.BlockSpec((1, Lk, D), lambda b: (b, 0, 0)),
        pl.BlockSpec((1, Lk, D), lambda b: (b, 0, 0)),
        pl.BlockSpec((1, mq, Lk), lambda b: (b, 0, 0)),
    ]
    if return_attention:
        out_shape = (jax.ShapeDtypeStruct((B, Lq, D), q.dtype),
                     jax.ShapeDtypeStruct((B, n_heads, Lq, Lk), jnp.float32))
        out_specs = (pl.BlockSpec((1, Lq, D), lambda b: (b, 0, 0)),
                     pl.BlockSpec((1, n_heads, Lq, Lk), lambda b: (b, 0, 0, 0)))
    else:
        out_shape = jax.ShapeDtypeStruct((B, Lq, D), q.dtype)
        out_specs = pl.BlockSpec((1, Lq, D), lambda b: (b, 0, 0))

    res = pl.pallas_call(
        kern,
        out_shape=out_shape,
        grid=(B,),
        in_specs=in_specs,
        out_specs=out_specs,
        compiler_params=pltpu.CompilerParams(
            dimension_semantics=("parallel",)),
    )(q, k, v, mask)

    if return_attention:
        return res
    return res, None


# ----------------------------------------------------------------------------
# Model glue (reshapes / parameter plumbing in plain JAX)
# ----------------------------------------------------------------------------
def multi_head_attention(p, query, key, value, mask, n_heads, return_attention):
    """Returns pre-fc_o context [B,Lq,D] and (optionally) attention weights."""
    B, Lq, D = query.shape
    Lk = key.shape[1]

    if key is query:                                   # self-attention: fused QKV
        w_qkv = jnp.concatenate([p["wq"], p["wk"], p["wv"]], axis=1)
        b_qkv = jnp.concatenate([p["bq"], p["bk"], p["bv"]], axis=0)
        qkv = linear(query.reshape(B * Lq, D), w_qkv, b_qkv)
        Q = qkv[:, :D].reshape(B, Lq, D)
        K = qkv[:, D:2 * D].reshape(B, Lq, D)
        V = qkv[:, 2 * D:].reshape(B, Lq, D)
    else:                                              # cross-attention: fused KV
        Q = linear(query.reshape(B * Lq, D), p["wq"], p["bq"]).reshape(B, Lq, D)
        w_kv = jnp.concatenate([p["wk"], p["wv"]], axis=1)
        b_kv = jnp.concatenate([p["bk"], p["bv"]], axis=0)
        kv = linear(key.reshape(B * Lk, D), w_kv, b_kv)
        K = kv[:, :D].reshape(B, Lk, D)
        V = kv[:, D:].reshape(B, Lk, D)

    mask3 = mask[:, 0]                                 # [B,1,mq,Lk] -> [B,mq,Lk]
    ctx, attention = mha_core(Q, K, V, mask3, n_heads, return_attention)
    return ctx, attention


def decoder_layer(p, trg, enc_src, trg_mask, src_mask, n_heads, want_attention):
    B, L, D = trg.shape

    # self-attention (+ fused fc_o + residual + LayerNorm)
    sa_ctx, _ = multi_head_attention(p["self_attn"], trg, trg, trg,
                                     trg_mask, n_heads, False)
    trg = linear_res_ln(sa_ctx.reshape(B * L, D),
                        p["self_attn"]["wo"], p["self_attn"]["bo"],
                        trg.reshape(B * L, D),
                        p["ln1_g"], p["ln1_b"]).reshape(B, L, D)

    # encoder attention (+ fused fc_o + residual + LayerNorm)
    ca_ctx, attention = multi_head_attention(p["enc_attn"], trg, enc_src, enc_src,
                                             src_mask, n_heads, want_attention)
    trg = linear_res_ln(ca_ctx.reshape(B * L, D),
                        p["enc_attn"]["wo"], p["enc_attn"]["bo"],
                        trg.reshape(B * L, D),
                        p["ln2_g"], p["ln2_b"]).reshape(B, L, D)

    # fully fused FFN + residual + LayerNorm
    trg = ffn_res_ln(trg.reshape(B * L, D), p["ffn"],
                     trg.reshape(B * L, D),
                     p["ln3_g"], p["ln3_b"]).reshape(B, L, D)
    return trg, attention


def decoder_forward(params, trg_tokens, enc_src, trg_mask, src_mask, n_heads):
    B, L = trg_tokens.shape
    D = params["tok_emb"].shape[1]
    pos = jnp.broadcast_to(jnp.arange(L)[None, :], (B, L))
    # embedding gathers are glue; scale/add is elementwise on tiny tensors
    trg = (jnp.take(params["tok_emb"], trg_tokens, axis=0) * math.sqrt(D)
           + jnp.take(params["pos_emb"], pos, axis=0))

    n_layers = len(params["layers"])
    attention = None
    for li, lp in enumerate(params["layers"]):
        trg, attention = decoder_layer(lp, trg, enc_src, trg_mask, src_mask,
                                       n_heads, want_attention=(li == n_layers - 1))

    out = linear(trg.reshape(B * L, D), params["w_out"], params["b_out"])
    out = out.reshape(B, L, -1)
    return out, attention


# ----------------------------------------------------------------------------
# Deterministic parameter init
# ----------------------------------------------------------------------------
def init_params(key, output_dim, hid_dim, n_layers, pf_dim, max_length=500):
    def nrm(k, shape):
        return jax.random.normal(k, shape, jnp.float32) * 0.02

    keys = iter(jax.random.split(key, 8 + n_layers * 32))

    def attn_params():
        return {
            "wq": nrm(next(keys), (hid_dim, hid_dim)), "bq": jnp.zeros((hid_dim,)),
            "wk": nrm(next(keys), (hid_dim, hid_dim)), "bk": jnp.zeros((hid_dim,)),
            "wv": nrm(next(keys), (hid_dim, hid_dim)), "bv": jnp.zeros((hid_dim,)),
            "wo": nrm(next(keys), (hid_dim, hid_dim)), "bo": jnp.zeros((hid_dim,)),
        }

    layers = []
    for _ in range(n_layers):
        layers.append({
            "self_attn": attn_params(),
            "enc_attn": attn_params(),
            "ffn": {
                "w1": nrm(next(keys), (hid_dim, pf_dim)), "b1": jnp.zeros((pf_dim,)),
                "w2": nrm(next(keys), (pf_dim, hid_dim)), "b2": jnp.zeros((hid_dim,)),
            },
            "ln1_g": jnp.ones((hid_dim,)), "ln1_b": jnp.zeros((hid_dim,)),
            "ln2_g": jnp.ones((hid_dim,)), "ln2_b": jnp.zeros((hid_dim,)),
            "ln3_g": jnp.ones((hid_dim,)), "ln3_b": jnp.zeros((hid_dim,)),
        })

    return {
        "tok_emb": nrm(next(keys), (output_dim, hid_dim)),
        "pos_emb": nrm(next(keys), (max_length, hid_dim)),
        "layers": layers,
        "w_out": nrm(next(keys), (hid_dim, output_dim)),
        "b_out": jnp.zeros((output_dim,)),
    }


# ----------------------------------------------------------------------------
if __name__ == "__main__":
    OUTPUT_DIM = 10
    HID_DIM = 32
    N_LAYERS = 2
    N_HEADS = 4
    PF_DIM = 64
    B = 2
    TRG_LEN = 8
    SRC_LEN = 8

    root = jax.random.PRNGKey(0)
    k_par, k_trg, k_enc = jax.random.split(root, 3)

    params = init_params(k_par, OUTPUT_DIM, HID_DIM, N_LAYERS, PF_DIM)

    trg_tokens = jax.random.randint(k_trg, (B, TRG_LEN), 0, OUTPUT_DIM)
    enc_src = jax.random.normal(k_enc, (B, SRC_LEN, HID_DIM), jnp.float32)

    # causal target mask [B,1,Lq,Lq]; full source mask [B,1,1,Lsrc]
    trg_mask = jnp.tril(jnp.ones((TRG_LEN, TRG_LEN), jnp.float32))[None, None]
    trg_mask = jnp.broadcast_to(trg_mask, (B, 1, TRG_LEN, TRG_LEN))
    src_mask = jnp.ones((B, 1, 1, SRC_LEN), jnp.float32)

    output, attention = decoder_forward(params, trg_tokens, enc_src,
                                        trg_mask, src_mask, N_HEADS)
    jax.block_until_ready((output, attention))

    assert output.shape == (B, TRG_LEN, OUTPUT_DIM)
    assert attention.shape == (B, N_HEADS, TRG_LEN, SRC_LEN)
    assert bool(jnp.all(jnp.isfinite(output)))
    assert bool(jnp.all(jnp.isfinite(attention)))
    print("KERNEL_OK")
</pallas_src>

<mosaic_0001>
module attributes {stable_mosaic.version = 11 : i64} {
  func.func @_matmul_kernel(%arg0: i32, %arg1: i32, %arg2: i32, %arg3: memref<16x32xf32, #tpu.memory_space<vmem>>, %arg4: memref<32x96xf32, #tpu.memory_space<vmem>>, %arg5: memref<1x96xf32, #tpu.memory_space<vmem>>, %arg6: memref<16x96xf32, #tpu.memory_space<vmem>>, %arg7: memref<16x96xf32, #tpu.memory_space<vmem>>) attributes {dimension_semantics = [#tpu.dimension_semantics<parallel>, #tpu.dimension_semantics<parallel>, #tpu.dimension_semantics<arbitrary>], iteration_bounds = array<i64: 1, 1, 1>, scalar_prefetch = 0 : i64, scratch_operands = 1 : i64, tpu.core_type = #tpu.core_type<tc>, window_params = [{transform_indices = @transform_0, window_bounds = array<i64: 16, 32>}, {transform_indices = @transform_1, window_bounds = array<i64: 32, 96>}, {transform_indices = @transform_2, window_bounds = array<i64: 1, 96>}, {transform_indices = @transform_3, window_bounds = array<i64: 16, 96>}]} {
    %c0_i32 = arith.constant 0 : i32
    %0 = arith.cmpi eq, %arg2, %c0_i32 : i32
    %1 = arith.extui %0 : i1 to i32
    %c0_i32_0 = arith.constant 0 : i32
    %2 = arith.cmpi ne, %1, %c0_i32_0 : i32
    scf.if %2 {
      %cst_10 = arith.constant 0.000000e+00 : f32
      %12 = vector.broadcast %cst_10 : f32 to vector<16x96xf32>
      %c0_11 = arith.constant 0 : index
      %c0_12 = arith.constant 0 : index
      %13 = vector.load %arg7[%c0_11, %c0_12] : memref<16x96xf32, #tpu.memory_space<vmem>>, vector<16x96xf32>
      tpu.vector_store %arg7[%c0_11, %c0_12], %12 {strides = array<i32>} : memref<16x96xf32, #tpu.memory_space<vmem>>, vector<16x96xf32>,
    } else {
    }
    %c0 = arith.constant 0 : index
    %c0_1 = arith.constant 0 : index
    %3 = vector.load %arg7[%c0, %c0_1] : memref<16x96xf32, #tpu.memory_space<vmem>>, vector<16x96xf32>
    %c0_2 = arith.constant 0 : index
    %c0_3 = arith.constant 0 : index
    %4 = vector.load %arg3[%c0_2, %c0_3] : memref<16x32xf32, #tpu.memory_space<vmem>>, vector<16x32xf32>
    %c0_4 = arith.constant 0 : index
    %c0_5 = arith.constant 0 : index
    %5 = vector.load %arg4[%c0_4, %c0_5] : memref<32x96xf32, #tpu.memory_space<vmem>>, vector<32x96xf32>
    %cst = arith.constant dense<0.000000e+00> : vector<16x96xf32>
    %6 = tpu.matmul %4, %5, %cst {dimension_numbers = #tpu.dot_dimension_numbers<[1], [0], [0], [1], [0, 0, 1, 1], [], []>} : vector<16x32xf32>, vector<32x96xf32>, vector<16x96xf32> -> vector<16x96xf32>
    %7 = arith.addf %3, %6 : vector<16x96xf32>
    %c0_6 = arith.constant 0 : index
    %c0_7 = arith.constant 0 : index
    %8 = vector.load %arg7[%c0_6, %c0_7] : memref<16x96xf32, #tpu.memory_space<vmem>>, vector<16x96xf32>
    tpu.vector_store %arg7[%c0_6, %c0_7], %7 {strides = array<i32>} : memref<16x96xf32, #tpu.memory_space<vmem>>, vector<16x96xf32>,
    %c0_i32_8 = arith.constant 0 : i32
    %9 = arith.cmpi eq, %arg2, %c0_i32_8 : i32
    %10 = arith.extui %9 : i1 to i32
    %c0_i32_9 = arith.constant 0 : i32
    %11 = arith.cmpi ne, %10, %c0_i32_9 : i32
    scf.if %11 {
      %c0_10 = arith.constant 0 : index
      %c0_11 = arith.constant 0 : index
      %12 = vector.load %arg7[%c0_10, %c0_11] : memref<16x96xf32, #tpu.memory_space<vmem>>, vector<16x96xf32>
      %c0_12 = arith.constant 0 : index
      %c0_13 = arith.constant 0 : index
      %13 = vector.load %arg5[%c0_12, %c0_13] : memref<1x96xf32, #tpu.memory_space<vmem>>, vector<1x96xf32>
      %14 = vector.broadcast %13 : vector<1x96xf32> to vector<16x96xf32>
      %15 = arith.addf %12, %14 : vector<16x96xf32>
      %c0_14 = arith.constant 0 : index
      %c0_15 = arith.constant 0 : index
      %16 = vector.load %arg6[%c0_14, %c0_15] : memref<16x96xf32, #tpu.memory_space<vmem>>, vector<16x96xf32>
      tpu.vector_store %arg6[%c0_14, %c0_15], %15 {strides = array<i32>} : memref<16x96xf32, #tpu.memory_space<vmem>>, vector<16x96xf32>,
    } else {
    }
    return
  }
  func.func @transform_0(%arg0: i32, %arg1: i32, %arg2: i32) -> (i32, i32) {
    %c0_i32 = arith.constant 0 : i32
    return %arg0, %arg2 : i32, i32
  }
  func.func @transform_1(%arg0: i32, %arg1: i32, %arg2: i32) -> (i32, i32) {
    %c0_i32 = arith.constant 0 : i32
    return %arg2, %arg1 : i32, i32
  }
  func.func @transform_2(%arg0: i32, %arg1: i32, %arg2: i32) -> (i32, i32) {
    %c0_i32 = arith.constant 0 : i32
    %c0_i32_0 = arith.constant 0 : i32
    return %c0_i32, %arg1 : i32, i32
  }
  func.func @transform_3(%arg0: i32, %arg1: i32, %arg2: i32) -> (i32, i32) {
    %c0_i32 = arith.constant 0 : i32
    return %arg0, %arg1 : i32, i32
  }
}

</mosaic_0001>

<bundles_post_ra>
// kernel: tpu_custom_call.1
= control target key start
LH: loop header
LB: loop body
LE: loop exit
PB: predicated region body
PF: predicated region fallthrough
CT: control target
= control target key end

     0   :  { %8 = vsyncpa [#allocation4], 0  ;;  %s326_s0 = inlined_call_operand.hbm [shape: f32[16,32], index: 0, kind: input, shape index: {}]   ;;  %s327_s1 = inlined_call_operand.hbm [shape: f32[32,96], index: 1, kind: input, shape index: {}]   ;;  %s328_s2 = inlined_call_operand.vmem [shape: f32[1,96], index: 2, kind: input, shape index: {}]   ;;  %s329_s3 = inlined_call_operand.hbm [shape: f32[16,96], index: 3, kind: output, shape index: {}]  }
   0x1   :  { %9 = vsyncpa [#allocation7], 0 }
   0x2   :  { %10 = vsyncpa [#allocation5], 0  ;;  %s271_s12 = smov [#allocation3]  }
   0x3   :  { %s16_s13 = sshll.u32 %s271_s12, 4  ;;  %s17_s13 = int_to_ptr.vmem [resolvable:$true] %s16_s13 }
   0x4   :  { %s213_s14 = scalar_lea.vmem %s17_s13, 256  ;;  %p218_p1 = scmp.lt.s32.totalorder %s17_s13, %s17_s13 }
   0x5   :  { %p214_p0 = scmp.ne.s32.totalorder %s17_s13, %s213_s14  ;;  %p219_p2 = scmp.lt.s32.totalorder %s213_s14, %s213_s14 }
   0x7   :  { %p220_p3 = por %p219_p2, %p218_p1 }
   0x9   :  { %p221_p4 = pnand %p220_p3, %p214_p0 }
   0xb   :  { %224 = shalt.err (!%p221_p4)
}
   0xc   :  { %s272_s15 = smov 128   ;;  %s273_s16 = smov 8  }
   0xd   :  { %22 = dma.hbm_to_vmem [thread:$0]  %s326_s0, 256, %s17_s13, [#allocation4], %s272_s15, %s272_s15, %s273_s16  }
   0xe   :  { %s274_s19 = smov [#allocation6]  }
   0xf   :  { %s28_s20 = sshll.u32 %s274_s19, 4  ;;  %s29_s20 = int_to_ptr.vmem [resolvable:$true] %s28_s20 }
  0x10   :  { %s233_s21 = scalar_lea.vmem %s29_s20, 512  ;;  %p238_p6 = scmp.lt.s32.totalorder %s29_s20, %s29_s20 }
  0x11   :  { %p234_p5 = scmp.ne.s32.totalorder %s29_s20, %s233_s21  ;;  %p239_p7 = scmp.lt.s32.totalorder %s233_s21, %s233_s21 }
  0x13   :  { %p240_p8 = por %p239_p7, %p238_p6 }
  0x15   :  { %p241_p9 = pnand %p240_p8, %p234_p5 }
  0x17   :  { %244 = shalt.err (!%p241_p9)
}
  0x18   :  { %34 = dma.hbm_to_vmem [thread:$0]  %s327_s1, 512, %s29_s20, [#allocation7], %s272_s15, %s272_s15, %s273_s16  }
  0x19   :  { %265 = dma.done.wait [#allocation4], 256  }
  0x1a   :  { %266 = vsyncadd [#allocation4], 4294967040 }
  0x1b   :  { %267 = dma.done.wait [#allocation7], 512  }
  0x1c   :  { %268 = vsyncadd [#allocation7], 4294966784  ;;  %vm47_vm0 = vcmask 785408   ;;  %v275_v0 = vmov 0.0   ;;  %vm58_vm1 = vcmask 261120   ;;  %v57_v1 = vld [vmem:[#allocation6 + $0x18] sm:$0xff] }
  0x1d   :  { %49 = vst.msk [vmem:[#allocation2 + $0x8] sm:$0xff] %vm47_vm0, %v275_v0  ;;  %48 = vst.msk [vmem:[#allocation2] sm:$0xff] %vm47_vm0, %v275_v0  ;;  %v56_v2 = vld [vmem:[#allocation6 + $0x10] sm:$0xff]  ;;  %188 = vmatprep.subr.mxu0 %v57_v1  ;;  %v55_v4 = vld [vmem:[#allocation6 + $0x8] sm:$0xff]  ;;  %s276_s24 = smov [#allocation8]  }
  0x1e   :  { %v52_v3 = vld [vmem:[#allocation3] sm:$0xff]  ;;  %189 = vmatpush3.msra.mxu0 %v57_v1  ;;  %v54_v5 = vld [vmem:[#allocation6] sm:$0xff]  ;;  %v53_v6 = vld [vmem:[#allocation3 + $0x8] sm:$0xff]  ;;  %s166_s25 = sshll.u32 %s276_s24, 4  ;;  %s167_s25 = int_to_ptr.vmem [resolvable:$true] %s166_s25 }
  0x1f   :  { %196 = vmatprep.mubr.msk.f32.mxu0 %vm58_vm1, %v52_v3  ;;  %190 = vmatprep.subr.mxu0 %v56_v2  ;;  %v181_v13 = vld [vmem:[%s328_s2] ss:$0 sm:$0xff]  ;;  %s245_s26 = scalar_lea.vmem %s167_s25, 256  ;;  %p250_p11 = scmp.lt.s32.totalorder %s167_s25, %s167_s25 }
  0x20   :  { %191 = vmatpush3.msra.mxu0 %v56_v2  ;;  %p246_p10 = scmp.ne.s32.totalorder %s167_s25, %s245_s26  ;;  %p251_p12 = scmp.lt.s32.totalorder %s245_s26, %s245_s26 }
  0x21   :  { %192 = vmatprep.subr.mxu0 %v55_v4 }
  0x22   :  { %193 = vmatpush3.msra.mxu0 %v55_v4  ;;  %p252_p13 = por %p251_p12, %p250_p11 }
  0x23   :  { %194 = vmatprep.subr.mxu0 %v54_v5 }
  0x24   :  { %195 = vmatpush3.msra.mxu0 %v54_v5  ;;  %v51_v7 = vld [vmem:[#allocation2 + $0x8] sm:$0xff]  ;;  %v50_v9 = vld [vmem:[#allocation2] sm:$0xff]  ;;  %p253_p0 = pnand %p252_p13, %p246_p10 }
  0x25   :  { %197 = vmatmul.mubr.msk.f32.vlgmr.msra.gmra.mxu0 %vm58_vm1, %v53_v6 }
  0xe5   :  { %v198_v8 = vpop.f32.mrf.mxu0 }
  0xe6   :  { %v141_v10 = vadd.f32 %v198_v8, %v51_v7 }
  0xe7   :  { %v131_v11 = vpop.f32.mrf.mxu0 }
  0xe8   :  { %144 = vst.msk [vmem:[#allocation2 + $0x8] sm:$0xff] %vm47_vm0, %v141_v10  ;;  %v140_v12 = vadd.f32 %v131_v11, %v50_v9 }
  0xea   :  { %143 = vst.msk [vmem:[#allocation2] sm:$0xff] %vm47_vm0, %v140_v12 }
  0xef   :  { %v149_v14 = vld [vmem:[#allocation2 + $0x8] sm:$0xff] }
  0xf0   :  { %v158_v15 = vadd.f32 %v181_v13, %v149_v14 }
  0xf1   :  { %v148_v16 = vld [vmem:[#allocation2] sm:$0xff] }
  0xf2   :  { %v157_v17 = vadd.f32 %v181_v13, %v148_v16  ;;  %160 = vst.msk [vmem:[#allocation8 + $0x8] sm:$0xff] %vm47_vm0, %v158_v15 }
  0xf4   :  { %159 = vst.msk [vmem:[#allocation8] sm:$0xff] %vm47_vm0, %v157_v17 }
  0xf5   :  { %256 = shalt.err (!%p253_p0)
}
  0xf6   :  { %172 = dma.vmem_to_hbm [thread:$0]  %s167_s25, 256, %s329_s3, [#allocation5], %s272_s15, %s272_s15, %s273_s16  }
  0xf7   :  { %269 = dma.done.wait [#allocation5], 256  }
  0xf8   :  { %270 = vsyncadd [#allocation5], 4294967040 }
  0xf9   :  { %176 = vsyncpa [#allocation4], 1 }
  0xfa   :  { %177 = vsyncpa [#allocation7], 1 }
  0xfb   :  { %178 = vsyncpa [#allocation5], 1 }

</bundles_post_ra>
